<compile_context>
chip_gen: v7x
topology: tpu7x:2x2x1
jax: 0.10.0
libtpu: 0.0.40
codegen_flags: <defaults>
</compile_context>

<pallas_src>
import functools

import jax
import jax.numpy as jnp
from jax.experimental import pallas as pl
from jax.experimental.pallas import tpu as pltpu

DEFAULT_BLOCK_BATCH = 4096   # batch rows per grid step


def _round_up(x, m):
    return (x + m - 1) // m * m


def dqn_kernel(x_ref, w1_ref, b1_ref, w2_ref, b2_ref, o_ref):
    # hidden = relu(x @ W1 + b1): f32 matmul with f32 accumulation.
    h = jnp.dot(x_ref[...], w1_ref[...], preferred_element_type=jnp.float32)
    h = jnp.maximum(h + b1_ref[...], 0.0)
    # out = h @ W2 + b2, written at the true (tb, out_dim) width.
    out = jnp.dot(h, w2_ref[...], preferred_element_type=jnp.float32)
    o_ref[...] = (out + b2_ref[...]).astype(o_ref.dtype)


@functools.partial(jax.jit, static_argnames=("block_batch",))
def dqn_forward(x, w1, b1, w2, b2, *, block_batch=DEFAULT_BLOCK_BATCH):
    """relu(x @ W1 + b1) @ W2 + b2, batch-tiled with a fused Pallas kernel."""
    batch, in_dim = x.shape
    hidden = w1.shape[1]
    out_dim = w2.shape[1]

    # Batch tile: multiple of 8 sublanes, capped at block_batch.  No padding
    # of x / out — Pallas handles the partial last block (grid = cdiv).
    tb = min(block_batch, _round_up(batch, 8))
    grid = (pl.cdiv(batch, tb),)

    return pl.pallas_call(
        dqn_kernel,
        out_shape=jax.ShapeDtypeStruct((batch, out_dim), jnp.float32),
        grid_spec=pltpu.PrefetchScalarGridSpec(
            num_scalar_prefetch=0,
            grid=grid,
            in_specs=[
                # activations: streamed per batch tile (auto double-buffered)
                pl.BlockSpec((tb, in_dim), lambda i: (i, 0)),
                # weights / biases: pinned in VMEM (constant block index)
                pl.BlockSpec((in_dim, hidden), lambda i: (0, 0)),
                pl.BlockSpec((1, hidden), lambda i: (0, 0)),
                pl.BlockSpec((hidden, out_dim), lambda i: (0, 0)),
                pl.BlockSpec((1, out_dim), lambda i: (0, 0)),
            ],
            out_specs=pl.BlockSpec((tb, out_dim), lambda i: (i, 0)),
        ),
        compiler_params=pltpu.CompilerParams(
            dimension_semantics=("parallel",),  # v7x: shard batch tiles across TCs
        ),
    )(x, w1, b1, w2, b2)


def init_dqn_params(key, in_dim, out_dim, hidden=64):
    """Mirror DQN.initialize_params: xavier_normal_ on weights, zeros on biases."""
    k1, k2 = jax.random.split(key)

    def xavier_normal(k, fan_in, fan_out):
        std = (2.0 / (fan_in + fan_out)) ** 0.5
        # stored (fan_in, fan_out) = transpose of PyTorch's (out, in); std identical
        return std * jax.random.normal(k, (fan_in, fan_out), dtype=jnp.float32)

    w1 = xavier_normal(k1, in_dim, hidden)
    b1 = jnp.zeros((1, hidden), dtype=jnp.float32)
    w2 = xavier_normal(k2, hidden, out_dim)
    b2 = jnp.zeros((1, out_dim), dtype=jnp.float32)
    return w1, b1, w2, b2


if __name__ == "__main__":
    key = jax.random.PRNGKey(0)
    k_params, k_x1, k_x2 = jax.random.split(key, 3)

    in_dim, out_dim = 4, 2  # CartPole-like state/action dims
    w1, b1, w2, b2 = init_dqn_params(k_params, in_dim, out_dim)

    # --- small batch (single grid step) ---
    batch = 8
    x = jax.random.normal(k_x1, (batch, in_dim), dtype=jnp.float32)
    out = dqn_forward(x, w1, b1, w2, b2)
    jax.block_until_ready(out)

    ref = jnp.maximum(x @ w1 + b1, 0.0) @ w2 + b2
    assert out.shape == (batch, out_dim)
    assert jnp.allclose(out, ref, atol=1e-4, rtol=1e-4), "small-batch mismatch"

    # --- multi-tile batch with a partial last block (grid > 1, batch % tb != 0) ---
    batch2 = 200
    x2 = jax.random.normal(k_x2, (batch2, in_dim), dtype=jnp.float32)
    out2 = dqn_forward(x2, w1, b1, w2, b2, block_batch=64)
    jax.block_until_ready(out2)

    ref2 = jnp.maximum(x2 @ w1 + b1, 0.0) @ w2 + b2
    assert out2.shape == (batch2, out_dim)
    assert jnp.allclose(out2, ref2, atol=1e-4, rtol=1e-4), "multi-tile mismatch"

    print("KERNEL_OK")
</pallas_src>

<mosaic_0001>
module attributes {stable_mosaic.version = 11 : i64} {
  func.func @dqn_kernel(%arg0: i32, %arg1: memref<8x4xf32, #tpu.memory_space<vmem>>, %arg2: memref<4x64xf32, #tpu.memory_space<vmem>>, %arg3: memref<1x64xf32, #tpu.memory_space<vmem>>, %arg4: memref<64x2xf32, #tpu.memory_space<vmem>>, %arg5: memref<1x2xf32, #tpu.memory_space<vmem>>, %arg6: memref<8x2xf32, #tpu.memory_space<vmem>>) attributes {dimension_semantics = [#tpu.dimension_semantics<parallel>], iteration_bounds = array<i64: 1>, scalar_prefetch = 0 : i64, scratch_operands = 0 : i64, tpu.core_type = #tpu.core_type<tc>, window_params = [{transform_indices = @transform_0, window_bounds = array<i64: 8, 4>}, {pipeline_mode = #tpu.pipeline_mode<synchronous>, transform_indices = @transform_1, window_bounds = array<i64: 4, 64>}, {pipeline_mode = #tpu.pipeline_mode<synchronous>, transform_indices = @transform_2, window_bounds = array<i64: 1, 64>}, {pipeline_mode = #tpu.pipeline_mode<synchronous>, transform_indices = @transform_3, window_bounds = array<i64: 64, 2>}, {pipeline_mode = #tpu.pipeline_mode<synchronous>, transform_indices = @transform_4, window_bounds = array<i64: 1, 2>}, {transform_indices = @transform_5, window_bounds = array<i64: 8, 2>}]} {
    %c0 = arith.constant 0 : index
    %c0_0 = arith.constant 0 : index
    %0 = vector.load %arg1[%c0, %c0_0] : memref<8x4xf32, #tpu.memory_space<vmem>>, vector<8x4xf32>
    %c0_1 = arith.constant 0 : index
    %c0_2 = arith.constant 0 : index
    %1 = vector.load %arg2[%c0_1, %c0_2] : memref<4x64xf32, #tpu.memory_space<vmem>>, vector<4x64xf32>
    %cst = arith.constant dense<0.000000e+00> : vector<8x64xf32>
    %2 = tpu.matmul %0, %1, %cst {dimension_numbers = #tpu.dot_dimension_numbers<[1], [0], [0], [1], [0, 0, 1, 1], [], []>} : vector<8x4xf32>, vector<4x64xf32>, vector<8x64xf32> -> vector<8x64xf32>
    %c0_3 = arith.constant 0 : index
    %c0_4 = arith.constant 0 : index
    %3 = vector.load %arg3[%c0_3, %c0_4] : memref<1x64xf32, #tpu.memory_space<vmem>>, vector<1x64xf32>
    %4 = vector.broadcast %3 : vector<1x64xf32> to vector<8x64xf32>
    %5 = arith.addf %2, %4 : vector<8x64xf32>
    %cst_5 = arith.constant 0.000000e+00 : f32
    %6 = vector.broadcast %cst_5 : f32 to vector<8x64xf32>
    %7 = arith.maximumf %5, %6 : vector<8x64xf32>
    %c0_6 = arith.constant 0 : index
    %c0_7 = arith.constant 0 : index
    %8 = vector.load %arg4[%c0_6, %c0_7] : memref<64x2xf32, #tpu.memory_space<vmem>>, vector<64x2xf32>
    %cst_8 = arith.constant dense<0.000000e+00> : vector<8x2xf32>
    %9 = tpu.matmul %7, %8, %cst_8 {dimension_numbers = #tpu.dot_dimension_numbers<[1], [0], [0], [1], [0, 0, 1, 1], [], []>} : vector<8x64xf32>, vector<64x2xf32>, vector<8x2xf32> -> vector<8x2xf32>
    %c0_9 = arith.constant 0 : index
    %c0_10 = arith.constant 0 : index
    %10 = vector.load %arg5[%c0_9, %c0_10] : memref<1x2xf32, #tpu.memory_space<vmem>>, vector<1x2xf32>
    %11 = vector.broadcast %10 : vector<1x2xf32> to vector<8x2xf32>
    %12 = arith.addf %9, %11 : vector<8x2xf32>
    %c0_11 = arith.constant 0 : index
    %c0_12 = arith.constant 0 : index
    %13 = vector.load %arg6[%c0_11, %c0_12] : memref<8x2xf32, #tpu.memory_space<vmem>>, vector<8x2xf32>
    tpu.vector_store %arg6[%c0_11, %c0_12], %12 {strides = array<i32>} : memref<8x2xf32, #tpu.memory_space<vmem>>, vector<8x2xf32>,
    return
  }
  func.func @transform_0(%arg0: i32) -> (i32, i32) {
    %c0_i32 = arith.constant 0 : i32
    %c0_i32_0 = arith.constant 0 : i32
    return %arg0, %c0_i32 : i32, i32
  }
  func.func @transform_1(%arg0: i32) -> (i32, i32) {
    %c0_i32 = arith.constant 0 : i32
    %c0_i32_0 = arith.constant 0 : i32
    %c0_i32_1 = arith.constant 0 : i32
    return %c0_i32, %c0_i32_0 : i32, i32
  }
  func.func @transform_2(%arg0: i32) -> (i32, i32) {
    %c0_i32 = arith.constant 0 : i32
    %c0_i32_0 = arith.constant 0 : i32
    %c0_i32_1 = arith.constant 0 : i32
    return %c0_i32, %c0_i32_0 : i32, i32
  }
  func.func @transform_3(%arg0: i32) -> (i32, i32) {
    %c0_i32 = arith.constant 0 : i32
    %c0_i32_0 = arith.constant 0 : i32
    %c0_i32_1 = arith.constant 0 : i32
    return %c0_i32, %c0_i32_0 : i32, i32
  }
  func.func @transform_4(%arg0: i32) -> (i32, i32) {
    %c0_i32 = arith.constant 0 : i32
    %c0_i32_0 = arith.constant 0 : i32
    %c0_i32_1 = arith.constant 0 : i32
    return %c0_i32, %c0_i32_0 : i32, i32
  }
  func.func @transform_5(%arg0: i32) -> (i32, i32) {
    %c0_i32 = arith.constant 0 : i32
    %c0_i32_0 = arith.constant 0 : i32
    return %arg0, %c0_i32 : i32, i32
  }
}

</mosaic_0001>

<bundles_post_ra>
// kernel: dqn_forward.1
= control target key start
LH: loop header
LB: loop body
LE: loop exit
PB: predicated region body
PF: predicated region fallthrough
CT: control target
= control target key end

     0   :  { %vm33_vm0 = vcmask 1043456   ;;  %vm29_vm1 = vcmask 31744   ;;  %v258_v0 = vmov 0.0   ;;  %vm259_vm2 = vmmov 0   ;;  %s330_s1 = inlined_call_operand.vmem [shape: f32[4,64], index: 1, kind: input, shape index: {}]   ;;  %s331_s0 = inlined_call_operand.vmem [shape: f32[8,4], index: 0, kind: input, shape index: {}]   ;;  %s332_s3 = inlined_call_operand.vmem [shape: f32[64,2], index: 3, kind: input, shape index: {}]   ;;  %s333_s2 = inlined_call_operand.vmem [shape: f32[1,64], index: 2, kind: input, shape index: {}]   ;;  %s334_s4 = inlined_call_operand.vmem [shape: f32[1,2], index: 4, kind: input, shape index: {}]   ;;  %s335_s5 = inlined_call_operand.vmem [shape: f32[8,2], index: 5, kind: output, shape index: {}]  }
   0x1   :  { %219 = vmatprep.subr.mxu0 %v258_v0  ;;  %v21_v1 = vld [vmem:[%s330_s1] sm:$0xf]  ;;  %221 = vmatprep.mubr.msk.f32.mxu0 %vm259_vm2, %v258_v0  ;;  %v260_v4 = vmov 0.0|0.0   ;;  %v109_v5 = vld [vmem:[%s332_s3 + $0x8] sm:$0xff]  ;;  %v110_v6 = vld [vmem:[%s332_s3 + $0x10] sm:$0xff]  ;;  %vm123_vm3 = vcmask 523264  }
   0x2   :  { %v20_v2 = vld [vmem:[%s331_s0] sm:$0xff]  ;;  %220 = vmatpush3.msk.msra.mxu0 %vm33_vm0, %v21_v1  ;;  %243 = vmatprep.subr.bf16.mxu1 %v260_v4  ;;  %v111_v7 = vld [vmem:[%s332_s3 + $0x18] sm:$0xff]  ;;  %v113_v11 = vld [vmem:[%s332_s3 + $0x28] sm:$0xff]  ;;  %vm197_vm4 = vcmask 15360  }
   0x3   :  { %v108_v3 = vld [vmem:[%s332_s3] sm:$0xff]  ;;  %222 = vmatmul.mubr.msk.f32.vlgmr.msra.gmra.mrb[0].mxu0 %vm29_vm1, %v20_v2  ;;  %240 = vmatprep.mubr.msk.f32.mxu1 %vm259_vm2, %v258_v0  ;;  %v247_v9 = vpack.c.bf16 %v111_v7, %v110_v6  ;;  %v114_v13 = vld [vmem:[%s332_s3 + $0x30] sm:$0xff]  ;;  %v115_v14 = vld [vmem:[%s332_s3 + $0x38] sm:$0xff] }
   0x4   :  { %v244_v8 = vpack.c.bf16 %v109_v5, %v108_v3  ;;  %v112_v10 = vld [vmem:[%s332_s3 + $0x20] sm:$0xff]  ;;  %v253_v15 = vpack.c.bf16 %v115_v14, %v114_v13 }
   0x5   :  { %v250_v12 = vpack.c.bf16 %v113_v11, %v112_v10  ;;  %v203_v16 = vld [vmem:[%s333_s2] ss:$0 sm:$0xff] }
   0x6   :  { %245 = vmatpush3.bf16.msra.mxu1 %v244_v8  ;;  %v206_v21 = vld [vmem:[%s334_s4] ss:$0 sm:$0xff] }
   0x7   :  { %246 = vmatprep.subr.bf16.mxu1 %v260_v4 }
   0xa   :  { %248 = vmatpush3.bf16.msra.mxu1 %v247_v9 }
   0xb   :  { %249 = vmatprep.subr.bf16.mxu1 %v260_v4 }
   0xe   :  { %251 = vmatpush3.bf16.msra.mxu1 %v250_v12 }
   0xf   :  { %252 = vmatprep.subr.bf16.mxu1 %v260_v4 }
  0x12   :  { %254 = vmatpush3.bf16.msra.mxu1 %v253_v15 }
  0xd6   :  { %v103_v17 = vpop.f32.mrb[0].mxu0 }
  0xd7   :  { %v104_v18 = vadd.f32 %v203_v16, %v103_v17  ;;  %v223_v19 = vpop.f32.mrb[1].mxu0 }
  0xd9   :  { %v107_v20 = vmax.f32 %v104_v18, 0.0 }
  0xdb   :  { %241 = vmatmul.mubr.msk.f32.vlgmr.msra.gmra.mrb[0].mxu1 %vm123_vm3, %v107_v20 }
 0x1ae   :  { %v193_v22 = vpop.f32.mrb[0].mxu1 }
 0x1af   :  { %v194_v23 = vadd.f32 %v206_v21, %v193_v22  ;;  %v242_v24 = vpop.f32.mrb[1].mxu1 }
 0x1b1   :  { %198 = vst.msk [vmem:[%s335_s5] sm:$0xff] %vm197_vm4, %v194_v23 }

</bundles_post_ra>
